<compile_context>
chip_gen: v7x
topology: tpu7x:2x2x1
jax: 0.10.0
libtpu: 0.0.40
codegen_flags: <defaults>
</compile_context>

<pallas_src>
import functools

import jax
import jax.numpy as jnp
from jax.experimental import pallas as pl
from jax.experimental.pallas import tpu as pltpu


def _attention_kernel(x_ref, wq_ref, wk_ref, wv_ref, wproj_ref, bproj_ref,
                      out_ref, acc_ref, *, tokens, tokens_padded):
    """One (batch_block, head) grid step.

    x_ref:     (Bb*Np, DIM)  input tokens (batch-major, then token), resident across heads
    wq/wk/wv:  (H, DIM, d)   per-head projection weights (scale folded into wq)
    wproj_ref: (H, d, DIM)   per-head output-projection weights
    bproj_ref: (1, DIM)      output-projection bias
    out_ref:   (Bb*Np, DIM)  output tokens (written on the last head step)
    acc_ref:   (Bb*Np, DIM)  f32 accumulator scratch (persists across the head axis)
    """
    h = pl.program_id(1)
    n_heads = pl.num_programs(1)
    M, _ = x_ref.shape
    Np = tokens_padded
    Bb = M // Np
    d = wq_ref.shape[2]

    x = x_ref[...]

    def head_w(ref):
        w = ref[h]                       # dynamic leading-dim view: zero-cost slice, no relayout
        return w if w.dtype == x.dtype else w.astype(x.dtype)

    # ---- per-head q/k/v: plain 2-D MXU matmuls, K = DIM (head axis comes from the grid) ----
    q = jnp.dot(x, head_w(wq_ref), preferred_element_type=jnp.float32)   # (M, d)
    k = jnp.dot(x, head_w(wk_ref), preferred_element_type=jnp.float32)
    v = jnp.dot(x, head_w(wv_ref), preferred_element_type=jnp.float32)
    q = q.astype(x.dtype).reshape(Bb, Np, d)     # leading-dim split: free
    k = k.astype(x.dtype).reshape(Bb, Np, d)
    v = v.astype(x.dtype).reshape(Bb, Np, d)

    # ---- scores + fused softmax (f32 math, EUP exp + approx reciprocal) ----
    dots = jnp.einsum('bid,bjd->bij', q, k,
                      preferred_element_type=jnp.float32)                # (Bb, Np, Np)
    if tokens_padded != tokens:
        # mask padded key columns (padded x rows are zero => their keys would get weight 1)
        col = jax.lax.broadcasted_iota(jnp.int32, dots.shape, 2)
        dots = jnp.where(col < tokens, dots, jnp.float32(-1e30))
    m = jnp.max(dots, axis=-1, keepdims=True)
    e = jnp.exp(dots - m)
    attn = (e * pl.reciprocal(jnp.sum(e, axis=-1, keepdims=True),
                              approx=True)).astype(x.dtype)
    # attn_drop / proj_drop have p=0.0 -> identity.

    # ---- attn @ v, then this head's contribution to the output projection ----
    ctx = jnp.einsum('bij,bjd->bid', attn, v,
                     preferred_element_type=jnp.float32)                 # (Bb, Np, d)
    ctx = ctx.astype(x.dtype).reshape(M, d)                              # merge leading dims: free
    contrib = jnp.dot(ctx, head_w(wproj_ref),
                      preferred_element_type=jnp.float32)                # (M, DIM)

    @pl.when(h == 0)
    def _():
        acc_ref[...] = jnp.zeros_like(acc_ref)

    acc_ref[...] += contrib

    @pl.when(h == n_heads - 1)
    def _():
        out_ref[...] = (acc_ref[...] + bproj_ref[...].astype(jnp.float32)).astype(out_ref.dtype)


def prepare_attention_params(w_qkv, w_proj, b_proj, *, num_heads, dtype=None):
    """One-time weight re-layout (hoisted out of the per-call path).

    w_qkv:  (3*DIM, DIM)  PyTorch Linear layout (out, in); qkv_bias=False
    w_proj: (DIM, DIM)    PyTorch Linear layout (out, in)
    b_proj: (DIM,)
    dtype:  optional storage dtype (pass jnp.bfloat16 in production to halve weight DMA;
            the softmax scale is folded BEFORE the cast).
    """
    out3, DIM = w_qkv.shape
    assert out3 == 3 * DIM
    H = num_heads
    d = DIM // H
    scale = d ** (-0.5)

    def per_head(w):                     # (DIM_out, DIM_in) -> (H, DIM_in, d)
        return jnp.transpose(w.reshape(H, d, DIM), (0, 2, 1))

    wq_heads = per_head(w_qkv[:DIM]) * jnp.asarray(scale, w_qkv.dtype)   # scale folded into q
    wk_heads = per_head(w_qkv[DIM:2 * DIM])
    wv_heads = per_head(w_qkv[2 * DIM:])
    wproj_heads = jnp.transpose(w_proj).reshape(H, d, DIM)               # (H, d, DIM)
    bproj2d = b_proj.reshape(1, DIM)

    params = (wq_heads, wk_heads, wv_heads, wproj_heads, bproj2d)
    if dtype is not None:
        params = tuple(p.astype(dtype) for p in params)
    return params


def _vmem_capacity_bytes():
    try:
        return int(pltpu.get_tpu_info().vmem_capacity_bytes)
    except Exception:
        return 64 << 20          # conservative fallback (v7x per-TensorCore VMEM)


def _choose_batch_block(B, Np, DIM, d, act_bytes, w_bytes, budget_bytes):
    """Largest divisor of B whose per-step VMEM working set fits the budget, while keeping
    the batch grid >= 2 steps (so 'parallel' batch sharding feeds both TCs on v7x)."""
    weights = 2 * (4 * DIM * DIM + DIM) * w_bytes        # resident weights, double-buffered

    def step_bytes(bb):
        M = bb * Np
        b = 2 * 2 * M * DIM * act_bytes                  # x + out tiles, double-buffered
        b += M * DIM * 4                                 # f32 accumulator scratch
        b += 3 * M * d * (4 + act_bytes)                 # q,k,v (f32 accum + narrowed copy)
        b += bb * Np * Np * (8 + act_bytes)              # dots + exp (f32) + attn (act dtype)
        b += M * d * (4 + act_bytes)                     # ctx
        b += M * DIM * 4                                 # per-head proj contribution (f32)
        return b + weights

    best = 1
    for c in range(1, B + 1):
        if B % c:
            continue
        if step_bytes(c) > budget_bytes:
            continue
        if B >= 2 and B // c < 2:
            continue
        best = c
    return best


def attention_forward(x, prepared_params, *, num_heads, batch_block=None,
                      vmem_limit_bytes=None):
    """x: (B, N, DIM). prepared_params from prepare_attention_params."""
    wq_heads, wk_heads, wv_heads, wproj_heads, bproj2d = prepared_params
    B, N, DIM = x.shape
    H = num_heads
    assert wq_heads.shape[0] == H
    d = DIM // H

    # Pad tokens to a multiple of 8 so (Bb*Np, DIM) blocks satisfy the (8,128) constraint
    # (real ViT N=197 -> 200); padded key columns are masked inside the kernel.
    Np = ((N + 7) // 8) * 8
    if Np != N:
        x = jnp.pad(x, ((0, 0), (0, Np - N), (0, 0)))

    cap = _vmem_capacity_bytes()
    if vmem_limit_bytes is None:
        vmem_limit_bytes = max(32 << 20, min(int(cap * 0.8), 100 << 20))
    if batch_block is None:
        batch_block = _choose_batch_block(B, Np, DIM, d,
                                          act_bytes=x.dtype.itemsize,
                                          w_bytes=wq_heads.dtype.itemsize,
                                          budget_bytes=int(cap * 0.45))
    Bb = batch_block
    assert B % Bb == 0, "batch_block must divide B"

    x2d = x.reshape(B * Np, DIM)                          # free, contiguous
    kernel = functools.partial(_attention_kernel, tokens=N, tokens_padded=Np)

    # TODO: for N >~ 512 add a KV grid axis with online softmax instead of full (Bb,N,N) scores.
    out2d = pl.pallas_call(
        kernel,
        out_shape=jax.ShapeDtypeStruct((B * Np, DIM), x.dtype),
        grid=(B // Bb, H),
        in_specs=[
            pl.BlockSpec((Bb * Np, DIM), lambda i, h: (i, 0)),     # resident across head axis
            pl.BlockSpec((H, DIM, d), lambda i, h: (0, 0, 0)),     # weights resident whole kernel
            pl.BlockSpec((H, DIM, d), lambda i, h: (0, 0, 0)),
            pl.BlockSpec((H, DIM, d), lambda i, h: (0, 0, 0)),
            pl.BlockSpec((H, d, DIM), lambda i, h: (0, 0, 0)),
            pl.BlockSpec((1, DIM), lambda i, h: (0, 0)),
        ],
        out_specs=pl.BlockSpec((Bb * Np, DIM), lambda i, h: (i, 0)),
        scratch_shapes=[pltpu.VMEM((Bb * Np, DIM), jnp.float32)],
        compiler_params=pltpu.CompilerParams(
            dimension_semantics=("parallel", "arbitrary"),
            vmem_limit_bytes=int(vmem_limit_bytes)),
    )(x2d, wq_heads, wk_heads, wv_heads, wproj_heads, bproj2d)

    out = out2d.reshape(B, Np, DIM)
    return out[:, :N, :] if Np != N else out


def _reference_forward(x, w_qkv, w_proj, b_proj, *, num_heads):
    """Plain-JAX reference mirroring the PyTorch module exactly."""
    B, N, DIM = x.shape
    d = DIM // num_heads
    scale = d ** (-0.5)
    qkv = jnp.einsum('bnc,oc->bno', x, w_qkv)                      # (B, N, 3*DIM)
    qkv = qkv.reshape(B, N, 3, num_heads, d)
    qkv = jnp.transpose(qkv, (2, 0, 3, 1, 4))                      # (qkv, b, h, n, d)
    q, k, v = qkv[0], qkv[1], qkv[2]
    dots = jnp.einsum('bhid,bhjd->bhij', q, k) * scale
    attn = jax.nn.softmax(dots, axis=-1)
    out = jnp.einsum('bhij,bhjd->bhid', attn, v)
    out = jnp.transpose(out, (0, 2, 1, 3)).reshape(B, N, DIM)
    return jnp.einsum('bnc,oc->bno', out, w_proj) + b_proj


if __name__ == "__main__":
    # Small ViT-ish shapes: batch=2, tokens=16, dim=64, heads=8 (head_dim=8).
    B, N, DIM, H = 2, 16, 64, 8

    key = jax.random.PRNGKey(0)
    kx, kw1, kw2, kb = jax.random.split(key, 4)

    x = jax.random.normal(kx, (B, N, DIM), dtype=jnp.float32)
    # PyTorch Linear weight layout: (out, in); qkv_bias=False -> no qkv bias.
    w_qkv = jax.random.normal(kw1, (3 * DIM, DIM), dtype=jnp.float32) * 0.05
    w_proj = jax.random.normal(kw2, (DIM, DIM), dtype=jnp.float32) * 0.05
    b_proj = jax.random.normal(kb, (DIM,), dtype=jnp.float32) * 0.05

    # f32 weights here so the demo check is tight; pass dtype=jnp.bfloat16 in production.
    params = prepare_attention_params(w_qkv, w_proj, b_proj, num_heads=H)

    out = jax.block_until_ready(attention_forward(x, params, num_heads=H))
    ref = _reference_forward(x, w_qkv, w_proj, b_proj, num_heads=H)
    assert out.shape == (B, N, DIM)
    max_err = float(jnp.max(jnp.abs(out - ref)))
    # Tolerance loosened slightly vs the f32 reference because the softmax denominator uses
    # the EUP approximate reciprocal (pl.reciprocal(..., approx=True)).
    assert jnp.allclose(out, ref, atol=2e-3, rtol=2e-3), f"mismatch (max err {max_err})"

    # Padded-token path (token count not a multiple of 8, like ViT's N=197).
    N2 = 13
    x2 = jax.random.normal(kx, (B, N2, DIM), dtype=jnp.float32)
    out2 = jax.block_until_ready(attention_forward(x2, params, num_heads=H))
    ref2 = _reference_forward(x2, w_qkv, w_proj, b_proj, num_heads=H)
    assert out2.shape == (B, N2, DIM)
    max_err2 = float(jnp.max(jnp.abs(out2 - ref2)))
    assert jnp.allclose(out2, ref2, atol=2e-3, rtol=2e-3), f"padded mismatch (max err {max_err2})"

    # TODO(synk): save_attn/save_v hooks, attn gradient hooks and relprop (LRP backward) are
    # stateful debugging features with no Pallas-forward equivalent; forward only.
    print("KERNEL_OK")
</pallas_src>

<mosaic_0001>
module attributes {stable_mosaic.version = 11 : i64} {
  func.func @_attention_kernel(%arg0: i32, %arg1: i32, %arg2: memref<16x64xf32, #tpu.memory_space<vmem>>, %arg3: memref<8x64x8xf32, #tpu.memory_space<vmem>>, %arg4: memref<8x64x8xf32, #tpu.memory_space<vmem>>, %arg5: memref<8x64x8xf32, #tpu.memory_space<vmem>>, %arg6: memref<8x8x64xf32, #tpu.memory_space<vmem>>, %arg7: memref<1x64xf32, #tpu.memory_space<vmem>>, %arg8: memref<16x64xf32, #tpu.memory_space<vmem>>, %arg9: memref<16x64xf32, #tpu.memory_space<vmem>>) attributes {dimension_semantics = [#tpu.dimension_semantics<parallel>, #tpu.dimension_semantics<arbitrary>], iteration_bounds = array<i64: 2, 8>, scalar_prefetch = 0 : i64, scratch_operands = 1 : i64, tpu.core_type = #tpu.core_type<tc>, window_params = [{transform_indices = @transform_0, window_bounds = array<i64: 16, 64>}, {pipeline_mode = #tpu.pipeline_mode<synchronous>, transform_indices = @transform_1, window_bounds = array<i64: 8, 64, 8>}, {pipeline_mode = #tpu.pipeline_mode<synchronous>, transform_indices = @transform_2, window_bounds = array<i64: 8, 64, 8>}, {pipeline_mode = #tpu.pipeline_mode<synchronous>, transform_indices = @transform_3, window_bounds = array<i64: 8, 64, 8>}, {pipeline_mode = #tpu.pipeline_mode<synchronous>, transform_indices = @transform_4, window_bounds = array<i64: 8, 8, 64>}, {pipeline_mode = #tpu.pipeline_mode<synchronous>, transform_indices = @transform_5, window_bounds = array<i64: 1, 64>}, {transform_indices = @transform_6, window_bounds = array<i64: 16, 64>}]} {
    %c0 = arith.constant 0 : index
    %c0_0 = arith.constant 0 : index
    %0 = vector.load %arg2[%c0, %c0_0] : memref<16x64xf32, #tpu.memory_space<vmem>>, vector<16x64xf32>
    %1 = arith.index_cast %arg1 : i32 to index
    %c0_1 = arith.constant 0 : index
    %c0_2 = arith.constant 0 : index
    %2 = vector.load %arg3[%1, %c0_1, %c0_2] : memref<8x64x8xf32, #tpu.memory_space<vmem>>, vector<1x64x8xf32>
    %3 = vector.shape_cast %2 : vector<1x64x8xf32> to vector<64x8xf32>
    %cst = arith.constant dense<0.000000e+00> : vector<16x8xf32>
    %4 = tpu.matmul %0, %3, %cst {dimension_numbers = #tpu.dot_dimension_numbers<[1], [0], [0], [1], [0, 0, 1, 1], [], []>} : vector<16x64xf32>, vector<64x8xf32>, vector<16x8xf32> -> vector<16x8xf32>
    %5 = arith.index_cast %arg1 : i32 to index
    %c0_3 = arith.constant 0 : index
    %c0_4 = arith.constant 0 : index
    %6 = vector.load %arg4[%5, %c0_3, %c0_4] : memref<8x64x8xf32, #tpu.memory_space<vmem>>, vector<1x64x8xf32>
    %7 = vector.shape_cast %6 : vector<1x64x8xf32> to vector<64x8xf32>
    %cst_5 = arith.constant dense<0.000000e+00> : vector<16x8xf32>
    %8 = tpu.matmul %0, %7, %cst_5 {dimension_numbers = #tpu.dot_dimension_numbers<[1], [0], [0], [1], [0, 0, 1, 1], [], []>} : vector<16x64xf32>, vector<64x8xf32>, vector<16x8xf32> -> vector<16x8xf32>
    %9 = arith.index_cast %arg1 : i32 to index
    %c0_6 = arith.constant 0 : index
    %c0_7 = arith.constant 0 : index
    %10 = vector.load %arg5[%9, %c0_6, %c0_7] : memref<8x64x8xf32, #tpu.memory_space<vmem>>, vector<1x64x8xf32>
    %11 = vector.shape_cast %10 : vector<1x64x8xf32> to vector<64x8xf32>
    %cst_8 = arith.constant dense<0.000000e+00> : vector<16x8xf32>
    %12 = tpu.matmul %0, %11, %cst_8 {dimension_numbers = #tpu.dot_dimension_numbers<[1], [0], [0], [1], [0, 0, 1, 1], [], []>} : vector<16x64xf32>, vector<64x8xf32>, vector<16x8xf32> -> vector<16x8xf32>
    %13 = vector.shape_cast %4 : vector<16x8xf32> to vector<1x16x8xf32>
    %14 = vector.shape_cast %8 : vector<16x8xf32> to vector<1x16x8xf32>
    %15 = vector.shape_cast %12 : vector<16x8xf32> to vector<1x16x8xf32>
    "tpu.trace_start"() <{level = 10 : i32, message = "bid,bjd->bij"}> : () -> ()
    %cst_9 = arith.constant dense<0.000000e+00> : vector<1x16x16xf32>
    %16 = tpu.matmul %13, %14, %cst_9 {dimension_numbers = #tpu.dot_dimension_numbers<[2], [2], [1], [1], [0, 0, 0, 1, 1, 1], [0], [0]>} : vector<1x16x8xf32>, vector<1x16x8xf32>, vector<1x16x16xf32> -> vector<1x16x16xf32>
    "tpu.trace_stop"() : () -> ()
    %cst_10 = arith.constant dense<0xFF800000> : vector<1x16xf32>
    %17 = vector.multi_reduction <maximumf>, %16, %cst_10 [2] : vector<1x16x16xf32> to vector<1x16xf32>
    %18 = vector.shape_cast %17 : vector<1x16xf32> to vector<1x16x1xf32>
    %19 = vector.broadcast %18 : vector<1x16x1xf32> to vector<1x16x16xf32>
    %20 = arith.subf %16, %19 : vector<1x16x16xf32>
    %21 = math.exp %20 : vector<1x16x16xf32>
    %cst_11 = arith.constant dense<0.000000e+00> : vector<1x16xf32>
    %22 = vector.multi_reduction <add>, %21, %cst_11 [2] : vector<1x16x16xf32> to vector<1x16xf32>
    %23 = vector.shape_cast %22 : vector<1x16xf32> to vector<1x16x1xf32>
    %24 = tpu.reciprocal %23 {approx = true} : vector<1x16x1xf32> -> vector<1x16x1xf32>
    %25 = vector.broadcast %24 : vector<1x16x1xf32> to vector<1x16x16xf32>
    %26 = arith.mulf %21, %25 : vector<1x16x16xf32>
    "tpu.trace_start"() <{level = 10 : i32, message = "bij,bjd->bid"}> : () -> ()
    %cst_12 = arith.constant dense<0.000000e+00> : vector<1x16x8xf32>
    %27 = tpu.matmul %26, %15, %cst_12 {dimension_numbers = #tpu.dot_dimension_numbers<[2], [1], [1], [2], [0, 0, 0, 1, 1, 2], [0], [0]>} : vector<1x16x16xf32>, vector<1x16x8xf32>, vector<1x16x8xf32> -> vector<1x16x8xf32>
    "tpu.trace_stop"() : () -> ()
    %28 = vector.shape_cast %27 : vector<1x16x8xf32> to vector<16x8xf32>
    %29 = arith.index_cast %arg1 : i32 to index
    %c0_13 = arith.constant 0 : index
    %c0_14 = arith.constant 0 : index
    %30 = vector.load %arg6[%29, %c0_13, %c0_14] : memref<8x8x64xf32, #tpu.memory_space<vmem>>, vector<1x8x64xf32>
    %31 = vector.shape_cast %30 : vector<1x8x64xf32> to vector<8x64xf32>
    %cst_15 = arith.constant dense<0.000000e+00> : vector<16x64xf32>
    %32 = tpu.matmul %28, %31, %cst_15 {dimension_numbers = #tpu.dot_dimension_numbers<[1], [0], [0], [1], [0, 0, 1, 1], [], []>} : vector<16x8xf32>, vector<8x64xf32>, vector<16x64xf32> -> vector<16x64xf32>
    %c0_i32 = arith.constant 0 : i32
    %33 = arith.cmpi eq, %arg1, %c0_i32 : i32
    %34 = arith.extui %33 : i1 to i32
    %c0_i32_16 = arith.constant 0 : i32
    %35 = arith.cmpi ne, %34, %c0_i32_16 : i32
    scf.if %35 {
      %cst_22 = arith.constant 0.000000e+00 : f32
      %42 = vector.broadcast %cst_22 : f32 to vector<16x64xf32>
      %c0_23 = arith.constant 0 : index
      %c0_24 = arith.constant 0 : index
      %43 = vector.load %arg9[%c0_23, %c0_24] : memref<16x64xf32, #tpu.memory_space<vmem>>, vector<16x64xf32>
      tpu.vector_store %arg9[%c0_23, %c0_24], %42 {strides = array<i32>} : memref<16x64xf32, #tpu.memory_space<vmem>>, vector<16x64xf32>,
    } else {
    }
    %c0_17 = arith.constant 0 : index
    %c0_18 = arith.constant 0 : index
    %36 = vector.load %arg9[%c0_17, %c0_18] : memref<16x64xf32, #tpu.memory_space<vmem>>, vector<16x64xf32>
    %37 = arith.addf %36, %32 : vector<16x64xf32>
    %c0_19 = arith.constant 0 : index
    %c0_20 = arith.constant 0 : index
    %38 = vector.load %arg9[%c0_19, %c0_20] : memref<16x64xf32, #tpu.memory_space<vmem>>, vector<16x64xf32>
    tpu.vector_store %arg9[%c0_19, %c0_20], %37 {strides = array<i32>} : memref<16x64xf32, #tpu.memory_space<vmem>>, vector<16x64xf32>,
    %c7_i32 = arith.constant 7 : i32
    %39 = arith.cmpi eq, %arg1, %c7_i32 : i32
    %40 = arith.extui %39 : i1 to i32
    %c0_i32_21 = arith.constant 0 : i32
    %41 = arith.cmpi ne, %40, %c0_i32_21 : i32
    scf.if %41 {
      %c0_22 = arith.constant 0 : index
      %c0_23 = arith.constant 0 : index
      %42 = vector.load %arg9[%c0_22, %c0_23] : memref<16x64xf32, #tpu.memory_space<vmem>>, vector<16x64xf32>
      %c0_24 = arith.constant 0 : index
      %c0_25 = arith.constant 0 : index
      %43 = vector.load %arg7[%c0_24, %c0_25] : memref<1x64xf32, #tpu.memory_space<vmem>>, vector<1x64xf32>
      %44 = vector.broadcast %43 : vector<1x64xf32> to vector<16x64xf32>
      %45 = arith.addf %42, %44 : vector<16x64xf32>
      %c0_26 = arith.constant 0 : index
      %c0_27 = arith.constant 0 : index
      %46 = vector.load %arg8[%c0_26, %c0_27] : memref<16x64xf32, #tpu.memory_space<vmem>>, vector<16x64xf32>
      tpu.vector_store %arg8[%c0_26, %c0_27], %45 {strides = array<i32>} : memref<16x64xf32, #tpu.memory_space<vmem>>, vector<16x64xf32>,
    } else {
    }
    return
  }
  func.func @transform_0(%arg0: i32, %arg1: i32) -> (i32, i32) {
    %c0_i32 = arith.constant 0 : i32
    %c0_i32_0 = arith.constant 0 : i32
    return %arg0, %c0_i32 : i32, i32
  }
  func.func @transform_1(%arg0: i32, %arg1: i32) -> (i32, i32, i32) {
    %c0_i32 = arith.constant 0 : i32
    %c0_i32_0 = arith.constant 0 : i32
    %c0_i32_1 = arith.constant 0 : i32
    %c0_i32_2 = arith.constant 0 : i32
    return %c0_i32, %c0_i32_0, %c0_i32_1 : i32, i32, i32
  }
  func.func @transform_2(%arg0: i32, %arg1: i32) -> (i32, i32, i32) {
    %c0_i32 = arith.constant 0 : i32
    %c0_i32_0 = arith.constant 0 : i32
    %c0_i32_1 = arith.constant 0 : i32
    %c0_i32_2 = arith.constant 0 : i32
    return %c0_i32, %c0_i32_0, %c0_i32_1 : i32, i32, i32
  }
  func.func @transform_3(%arg0: i32, %arg1: i32) -> (i32, i32, i32) {
    %c0_i32 = arith.constant 0 : i32
    %c0_i32_0 = arith.constant 0 : i32
    %c0_i32_1 = arith.constant 0 : i32
    %c0_i32_2 = arith.constant 0 : i32
    return %c0_i32, %c0_i32_0, %c0_i32_1 : i32, i32, i32
  }
  func.func @transform_4(%arg0: i32, %arg1: i32) -> (i32, i32, i32) {
    %c0_i32 = arith.constant 0 : i32
    %c0_i32_0 = arith.constant 0 : i32
    %c0_i32_1 = arith.constant 0 : i32
    %c0_i32_2 = arith.constant 0 : i32
    return %c0_i32, %c0_i32_0, %c0_i32_1 : i32, i32, i32
  }
  func.func @transform_5(%arg0: i32, %arg1: i32) -> (i32, i32) {
    %c0_i32 = arith.constant 0 : i32
    %c0_i32_0 = arith.constant 0 : i32
    %c0_i32_1 = arith.constant 0 : i32
    return %c0_i32, %c0_i32_0 : i32, i32
  }
  func.func @transform_6(%arg0: i32, %arg1: i32) -> (i32, i32) {
    %c0_i32 = arith.constant 0 : i32
    %c0_i32_0 = arith.constant 0 : i32
    return %arg0, %c0_i32 : i32, i32
  }
}

</mosaic_0001>

<bundles_post_ra>
// kernel: tpu_custom_call.1
= control target key start
LH: loop header
LB: loop body
LE: loop exit
PB: predicated region body
PF: predicated region fallthrough
CT: control target
= control target key end

     0   :  { %11 = vsyncpa [#allocation4], 0  ;;  %s1551_s0 = inlined_call_operand.vmem [shape: f32[32,64], index: 0, kind: input, shape index: {}]   ;;  %s1552_s1 = inlined_call_operand.vmem [shape: f32[8,64,8], index: 1, kind: input, shape index: {}]   ;;  %s1553_s2 = inlined_call_operand.vmem [shape: f32[8,64,8], index: 2, kind: input, shape index: {}]   ;;  %s1554_s3 = inlined_call_operand.vmem [shape: f32[8,64,8], index: 3, kind: input, shape index: {}]   ;;  %s1555_s4 = inlined_call_operand.vmem [shape: f32[8,8,64], index: 4, kind: input, shape index: {}]   ;;  %s1556_s5 = inlined_call_operand.vmem [shape: f32[1,64], index: 5, kind: input, shape index: {}]   ;;  %s1557_s6 = inlined_call_operand.hbm [shape: f32[32,64], index: 6, kind: output, shape index: {}]  }
   0x1   :  { %13 = vsyncpa [#allocation4 + $0x1], 0  ;;  %s1352_s21 = smov 0   ;;  %s1354_s22 = smov 0  }
   0x2   :  { %s1356_s23 = smov 0   ;;  %s1358_s24 = smov 0  }
   0x3   :  { %s1360_s25 = smov 0   ;;  %s1362_s26 = smov 0  }
   0x4   :  { %s1364_s27 = smov 0   ;;  %s1366_s28 = smov 0  }
   0x5 LB: > { %s927_s29 = sadd.s32 4294967295, %s1311_s28   ;;  %s928_s30 = sadd.s32 4294967294, %s1311_s28   ;;  %s1311_s28 = sphi %s1366_s28, %s19_s28   ;;  %s1307_s27 = sphi %s1364_s27, %s1566_s27   ;;  %s1303_s26 = sphi %s1362_s26, %s1565_s26   ;;  %s1299_s25 = sphi %s1360_s25, %s1564_s25   ;;  %s1295_s24 = sphi %s1358_s24, %s1563_s24   ;;  %s1291_s23 = sphi %s1356_s23, %s1562_s23   ;;  %s1287_s22 = sphi %s1354_s22, %s1561_s22   ;;  %s1283_s21 = sphi %s1352_s21, %s1560_s21  }
   0x6   : > { %s28_s7 = sadd.s32 1, %s1303_s26  ;;  %s31_s8 = sadd.s32 1, %s1307_s27 }
   0x7   : > { %p29_p0 = scmp.ge.s32.totalorder %s28_s7, 8  ;;  %p179_p1 = scmp.ne.s32.totalorder %s1291_s23, %s1287_s22 }
   0x8   : > { %p180_p2 = scmp.eq.s32.totalorder %s927_s29, 15  ;;  %p185_p4 = scmp.ne.s32.totalorder %s1287_s22, %s1283_s21 }
   0x9   : > { %s1568_s7 = smov (%p29_p0, %s28_s7), 0  ;;  %s1570_s8 = smov (!%p29_p0, %s31_s8), %s1307_s27 }
   0xa   : > { %p1401_p3 = por %p180_p2, %p179_p1  ;;  %p33_p5 = scmp.ge.s32.totalorder %s1570_s8, 2 }
   0xb   : > { %p186_p6 = scmp.eq.s32.totalorder %s928_s30, 15  ;;  %p931_p7 = scmp.ge.s32.totalorder %s1311_s28, 1 }
   0xc   : > { %p228_p8 = scmp.lt.s32.totalorder %s1311_s28, 17  ;;  %s1572_s8 = smov (%p33_p5, %s1570_s8), 0 }
   0xd   : > { %p1411_p9 = por %p186_p6, %p185_p4  ;;  %s166_s11 = ssub.s32 %s1307_s27, %s1572_s8 }
   0xe   : > { %p229_p10 = pnand %p931_p7, %p228_p8  ;;  %s169_s12 = sadd.s32 1, %s1291_s23 }
   0xf   : > { %p167_p11 = scmp.eq.s32.totalorder %s166_s11, 0  ;;  %s1422_s14 = sshll.u32 (!%p229_p10), %s1295_s24, 6  ;;  %vm277_vm0 = vcmask (!%p229_p10), 523264   ;;  %vm527_vm1 = vcmask (!%p229_p10), 64512   ;;  %vm615_vm3 = vcmask (!%p229_p10), 130048  }
  0x10   : > { %232 = sbr.rel (%p229_p10) target bundleno = 1258 (0x4ea), region = 44  ;;  %s255_s15 = sand.u32 (!%p229_p10), 1, %s1287_s22   ;;  %vm1126_vm2 = vmpackc.low (!%p229_p10), %vm527_vm1, %vm527_vm1 }
  0x11   : > { %s1419_s13 = scalar_select %p167_p11, %s1291_s23, %s169_s12  }
  0x12   : > { %s359_s18 = scalar_lea.vmem (!%p229_p10), %s1553_s2, %s1422_s14  ;;  %s1431_s19 = sshll.u32 (!%p229_p10), %s255_s15, 4 }
  0x13   : > { %v360_v0 = vld [vmem:[%s359_s18] sm:$0xff] (!%p229_p10)  ;;  %v361_v1 = vld [vmem:[%s359_s18 + $0x8] sm:$0xff] (!%p229_p10)  ;;  %v362_v2 = vld [vmem:[%s359_s18 + $0x10] sm:$0xff] (!%p229_p10)  ;;  %s1437_s30 = scalar_lea.vmem (!%p229_p10), %s1552_s1, %s1422_s14  ;;  %s933_s11 = sshll.u32 (!%p229_p10), %s1299_s25, 1 }
  0x14   : > { %v1093_v3 = vpack.c.bf16 (!%p229_p10), %v361_v1, %v360_v0  ;;  %v363_v4 = vld [vmem:[%s359_s18 + $0x18] sm:$0xff] (!%p229_p10)  ;;  %v269_v5 = vld [vmem:[%s1437_s30] sm:$0xff] (!%p229_p10)  ;;  %v270_v6 = vld [vmem:[%s1437_s30 + $0x8] sm:$0xff] (!%p229_p10)  ;;  %p259_p12 = scmp.lt.s32.totalorder (!%p229_p10), %s933_s11, 3  ;;  %s257_s17 = scalar_lea.vmem (!%p229_p10), [#allocation3], %s1431_s19 }
  0x15   : > { %v1097_v7 = vpack.c.bf16 (!%p229_p10), %v363_v4, %v362_v2  ;;  %v1077_v8 = vpack.c.bf16 (!%p229_p10), %v270_v6, %v269_v5  ;;  %v364_v9 = vld [vmem:[%s359_s18 + $0x20] sm:$0xff] (!%p229_p10)  ;;  %v365_v10 = vld [vmem:[%s359_s18 + $0x28] sm:$0xff] (!%p229_p10)  ;;  %v271_v11 = vld [vmem:[%s1437_s30 + $0x10] sm:$0xff] (!%p229_p10)  ;;  %p951_p13 = scmp.ne.s32.totalorder (!%p229_p10), %s1295_s24, 0 }
  0x16   : > { %1094 = vmatprep.subr.bf16.mxu1 (!%p229_p10), %v1093_v3  ;;  %v272_v12 = vld [vmem:[%s1437_s30 + $0x18] sm:$0xff] (!%p229_p10)  ;;  %v273_v14 = vld [vmem:[%s1437_s30 + $0x20] sm:$0xff] (!%p229_p10)  ;;  %v274_v15 = vld [vmem:[%s1437_s30 + $0x28] sm:$0xff] (!%p229_p10)  ;;  %v1101_v16 = vpack.c.bf16 (!%p229_p10), %v365_v10, %v364_v9 }
  0x17   : > { %1096 = vmatpush3.bf16.msra.mxu1 %v1093_v3  ;;  %1078 = vmatprep.subr.bf16.mxu0 %v1077_v8  ;;  %v1081_v13 = vpack.c.bf16 %v272_v12, %v271_v11  ;;  %s1574_s11 = smov (!%p259_p12, %s933_s11), 3  ;;  %v366_v17 = vld [vmem:[%s359_s18 + $0x30] sm:$0xff]  ;;  %v367_v18 = vld [vmem:[%s359_s18 + $0x38] sm:$0xff]  ;;  %v1085_v19 = vpack.c.bf16 %v274_v15, %v273_v14 }
  0x18   : > { %1098 = vmatprep.subr.bf16.mxu1 %v1097_v7  ;;  %1080 = vmatpush3.bf16.msra.mxu0 %v1077_v8  ;;  %s934_s12 = sshll.u32 %s1574_s11, 3  ;;  %v275_v20 = vld [vmem:[%s1437_s30 + $0x30] sm:$0xff]  ;;  %v276_v21 = vld [vmem:[%s1437_s30 + $0x38] sm:$0xff]  ;;  %v1105_v23 = vpack.c.bf16 %v367_v18, %v366_v17  ;;  %s443_s30 = scalar_lea.vmem %s1554_s3, %s1422_s14 }
  0x19   : > { %1082 = vmatprep.subr.bf16.mxu0 %v1081_v13  ;;  %s262_s20 = scalar_lea.vmem %s1551_s0, %s934_s12  ;;  %v1089_v24 = vpack.c.bf16 %v276_v21, %v275_v20  ;;  %v444_v31 = vld [vmem:[%s443_s30] sm:$0xff]  ;;  %v445_v32 = vld [vmem:[%s443_s30 + $0x8] sm:$0xff]  ;;  %v446_v33 = vld [vmem:[%s443_s30 + $0x10] sm:$0xff]  ;;  %s948_s14 = sshll.u32 %s1295_s24, 3 }
  0x1a   : > { %v265_v22 = vld [vmem:[%s262_s20] sm:$0xff]  ;;  %v266_v25 = vld [vmem:[%s262_s20 + $0x8] sm:$0xff]  ;;  %v1109_v34 = vpack.c.bf16 %v445_v32, %v444_v31  ;;  %v447_v35 = vld [vmem:[%s443_s30 + $0x18] sm:$0xff]  ;;  %s720_s16 = scalar_lea.vmem %s1555_s4, %s948_s14 }
  0x1b   : > { %1100 = vmatpush3.bf16.msra.mxu1 %v1097_v7  ;;  %1036 = vmatprep.mubr.msk.f32.mxu1 %vm277_vm0, %v265_v22  ;;  %v1113_v36 = vpack.c.bf16 %v447_v35, %v446_v33  ;;  %v448_v37 = vld [vmem:[%s443_s30 + $0x20] sm:$0xff]  ;;  %v449_v38 = vld [vmem:[%s443_s30 + $0x28] sm:$0xff]  ;;  %v450_v40 = vld [vmem:[%s443_s30 + $0x30] sm:$0xff]  ;;  %v1313_v7 = vmov (!%p951_p13), 0.0  }
  0x1c   : > { %1102 = vmatprep.subr.bf16.mxu1 %v1101_v16  ;;  %1084 = vmatpush3.bf16.msra.mxu0 %v1081_v13  ;;  %v1117_v39 = vpack.c.bf16 %v449_v38, %v448_v37  ;;  %v451_v41 = vld [vmem:[%s443_s30 + $0x38] sm:$0xff]  ;;  %v721_v60 = vld [vmem:[%s720_s16] sm:$0xff]  ;;  %807 = vst.msk [vmem:[#allocation2] sm:$0xff] (!%p951_p13), %vm277_vm0, %v1313_v7  ;;  %808 = vst.msk [vmem:[#allocation2 + $0x8] sm:$0xff] (!%p951_p13), %vm277_vm0, %v1313_v7 }
  0x1d   : > { %1086 = vmatprep.subr.bf16.mxu0 %v1085_v19  ;;  %1017 = vmatprep.mubr.msk.f32.mxu0 %vm277_vm0, %v265_v22  ;;  %v1121_v42 = vpack.c.bf16 %v451_v41, %v450_v40 }
  0x1f   : > { %1104 = vmatpush3.bf16.msra.mxu1 %v1101_v16 }
  0x20   : > { %1106 = vmatprep.subr.bf16.mxu1 %v1105_v23  ;;  %1088 = vmatpush3.bf16.msra.mxu0 %v1085_v19 }
  0x21   : > { %1090 = vmatprep.subr.bf16.mxu0 %v1089_v24 }
  0x23   : > { %1108 = vmatpush3.bf16.msra.mxu1 %v1105_v23 }
  0x24   : > { %1092 = vmatpush3.bf16.msra.mxu0 %v1089_v24 }
  0x25   : > { %1110 = vmatprep.subr.bf16.mxu0 %v1109_v34 }
  0x26   : > { %1037 = vmatmul.mubr.msk.f32.vlgmr.msra.gmra.mrb[0].mxu1 %vm277_vm0, %v266_v25 }
  0x27   : > { %1018 = vmatmul.mubr.msk.f32.vlgmr.msra.gmra.mrb[0].mxu0 %vm277_vm0, %v266_v25 }
  0x28   : > { %1055 = vmatprep.mubr.msk.f32.mxu0 %vm277_vm0, %v265_v22  ;;  %1112 = vmatpush3.bf16.msra.mxu0 %v1109_v34 }
  0x29   : > { %1114 = vmatprep.subr.bf16.mxu0 %v1113_v36 }
  0x2c   : > { %1116 = vmatpush3.bf16.msra.mxu0 %v1113_v36 }
  0x2d   : > { %1118 = vmatprep.subr.bf16.mxu0 %v1117_v39 }
  0x30   : > { %1120 = vmatpush3.bf16.msra.mxu0 %v1117_v39 }
  0x31   : > { %1122 = vmatprep.subr.bf16.mxu0 %v1121_v42 }
  0x34   : > { %1124 = vmatpush3.bf16.msra.mxu0 %v1121_v42 }
  0x37   : > { %1056 = vmatmul.mubr.msk.f32.vlgmr.msra.gmra.mrb[2].mxu0 %vm277_vm0, %v266_v25 }
  0xf9   : > { %v1038_v26 = vpop.f32.mrb[0].mxu1 }
  0xfa   : > { %v434_v27 = vpop.f32.mrb[1].mxu1  ;;  %v1019_v28 = vpop.f32.mrb[0].mxu0 }
  0xfb   : > { %v1125_v29 = vpack.c.bf16 %v1038_v26, %v434_v27  ;;  %v350_v30 = vpop.f32.mrb[1].mxu0 }
  0xfc   : > { %1062 = vmatprep.mubr.msk.f32.mxu1 %vm527_vm1, %v350_v30 }
  0xfd   : > { %1127 = vmatprep.subr.msk.bf16.mxu1 %vm1126_vm2, %v1125_v29 }
  0xfe   : > { %1130 = vmatpush3.bf16.xpose.msk.msra.mxu1 %vm1126_vm2, %v1125_v29 }
 0x105   : > { %1063 = vmatmul.mubr.msk.f32.vlgmr.msra.gmra.mrb[2].mxu1 %vm527_vm1, %v1019_v28 }
 0x10a   : > { %v1057_v57 = vpop.f32.mrb[2].mxu0 }
 0x10b   : > { %v518_v58 = vpop.f32.mrb[3].mxu0 }
 0x10c   : > { %v1131_v59 = vpack.c.bf16 %v1057_v57, %v518_v58 }
 0x10e   : > { %1132 = vmatprep.subr.bf16.mxu1 %v1131_v59 }
 0x10f   : > { %1134 = vmatpush3.bf16.msra.mxu1 %v1131_v59 }
 0x110   : > { %1072 = vmatprep.subr.mxu1 %v721_v60 }
 0x1d8   : > { %v1064_v43 = vpop.f32.mrb[2].mxu1 }
 0x1d9   : > { %v606_v44 = vpop.f32.mrb[3].mxu1  ;;  %v619_v46 = vsel %vm615_vm3, %v1064_v43, -inf }
 0x1da   : > { %v616_v45 = vsel %vm615_vm3, %v606_v44, -inf }
 0x1db   : > { %617 = vmax.xlane.f32.xlu0 %v616_v45 }
 0x1df   : > { %620 = vmax.xlane.f32.xlu0 %v619_v46 }
 0x268   : > { %v618_v47 = vpop.xlane.xlu0 %617 }
 0x269   : > { %v622_v48 = vsub.f32 %v606_v44, %v618_v47 }
 0x26b   : > { %v624_v49 = vmul.f32 1.442695, %v622_v48 }
 0x26c   : > { %v621_v50 = vpop.xlane.xlu0 %620 }
 0x26d   : > { %1209 = vpow2.f32 %v624_v49  ;;  %v623_v51 = vsub.f32 %v1064_v43, %v621_v50 }
 0x26f   : > { %v626_v52 = vmul.f32 1.442695, %v623_v51 }
 0x271   : > { %1211 = vpow2.f32 %v626_v52 }
 0x277   : > { %v1210_v53 = vpop.eup %1209 }
 0x278   : > { %v628_v54 = vsel %vm615_vm3, %v1210_v53, 0.0 }
 0x279   : > { %629 = vadd.xlane.f32.xlu1 %v628_v54 }
 0x27b   : > { %v1212_v55 = vpop.eup %1211 }
 0x27c   : > { %v631_v56 = vsel %vm615_vm3, %v1212_v55, 0.0 }
 0x27d   : > { %632 = vadd.xlane.f32.xlu1 %v631_v56 }
 0x306   : > { %v630_v61 = vpop.xlane.xlu1 %629 }
 0x307   : > { %1213 = vrcp.f32 %v630_v61 }
 0x30a   : > { %v633_v62 = vpop.xlane.xlu1 %632 }
 0x30b   : > { %1215 = vrcp.f32 %v633_v62 }
 0x311   : > { %v1214_v63 = vpop.eup %1213 }
 0x312   : > { %v636_v0 = vmul.f32 %v1214_v63, %v1210_v53 }
 0x314   : > { %1069 = vmatprep.mubr.msk.f32.mxu1 %vm615_vm3, %v636_v0 }
 0x315   : > { %v1216_v1 = vpop.eup %1215 }
 0x316   : > { %v637_v2 = vmul.f32 %v1216_v1, %v1212_v55 }
 0x318   : > { %1070 = vmatmul.mubr.msk.f32.vlgmr.msra.gmra.mrb[4].mxu1 %vm615_vm3, %v637_v2 }
 0x319   : > { %1073 = vmatpush3.msra.mxu1 %v721_v60 }
 0x3eb   : > { %v1071_v3 = vpop.f32.mrb[4].mxu1 }
 0x3ec   : > { %v710_v4 = vpop.f32.mrb[5].mxu1 }
 0x3ed   : > { %1074 = vmatprep.mubr.msk.f32.mxu1 %vm527_vm1, %v710_v4 }
 0x3ee   : > { %1075 = vmatmul.mubr.msk.f32.vlgmr.msra.gmra.mrb[6].mxu1 %vm527_vm1, %v1071_v3 }
 0x4bc   : > { %806 = sbr.rel (%p951_p13) target bundleno = 1219 (0x4c3), region = 48 }
 0x4c1   : > { %v1076_v5 = vpop.f32.mrb[6].mxu1 }
 0x4c2   : > { %v794_v6 = vpop.f32.mrb[7].mxu1 }
 0x4c3 PF: > { %v809_v8 = vld [vmem:[#allocation2] sm:$0xff]  ;;  %v810_v9 = vld [vmem:[#allocation2 + $0x8] sm:$0xff]  ;;  %p952_p0 = scmp.ne.s32.totalorder %s1295_s24, 7 }
 0x4c4   : > { %v811_v10 = vadd.f32 %v809_v8, %v794_v6  ;;  %v812_v11 = vadd.f32 %v1076_v5, %v810_v9  ;;  %v953_v13 = vld [vmem:[%s1556_s5] ss:$0 sm:$0xff] (!%p952_p0) }
 0x4c5   : > { %818 = sbr.rel (%p952_p0) target bundleno = 1233 (0x4d1), region = 52 }
 0x4c6   : > { %813 = vst.msk [vmem:[#allocation2] sm:$0xff] %vm277_vm0, %v811_v10  ;;  %814 = vst.msk [vmem:[#allocation2 + $0x8] sm:$0xff] %vm277_vm0, %v812_v11 }
 0x4cd   : > { %v819_v12 = vld [vmem:[#allocation2] sm:$0xff]  ;;  %v820_v14 = vld [vmem:[#allocation2 + $0x8] sm:$0xff] }
 0x4ce   : > { %v828_v15 = vadd.f32 %v953_v13, %v819_v12  ;;  %v829_v16 = vadd.f32 %v953_v13, %v820_v14 }
 0x4d0   : > { %830 = vst.msk [vmem:[%s257_s17] sm:$0xff] %vm277_vm0, %v828_v15  ;;  %831 = vst.msk [vmem:[%s257_s17 + $0x8] sm:$0xff] %vm277_vm0, %v829_v16 }
 0x4d1 PF: > { %s959_s18 = sshll.u32 %s1299_s25, 8  ;;  %s846_s14 = sshll.u32 %s257_s17, 4  ;;  %s1495_s14 = int_to_ptr.vmem [resolvable:$true] %s846_s14 }
 0x4d2   : > { %s1493_s30 = scalar_lea.hbm %s1557_s6, %s959_s18  ;;  %s1499_s11 = scalar_lea.sflag [#allocation4], %s255_s15 }
 0x4d3   : > { %s1217_s12 = scalar_lea.vmem %s1495_s14, 256  ;;  %s1314_s25 = smov [#allocation3]  }
 0x4d4   : > { %p1218_p1 = scmp.ne.s32.totalorder %s1495_s14, %s1217_s12  ;;  %s1221_s16 = sshll.u32 %s1314_s25, 4  ;;  %s1222_s16 = int_to_ptr.vmem [resolvable:$false] %s1221_s16 }
 0x4d5   : > { %s1223_s19 = scalar_lea.vmem %s1222_s16, 512  ;;  %p1224_p5 = scmp.lt.s32.totalorder %s1495_s14, %s1222_s16 }
 0x4d6   : > { %p1219_p2 = pnand %p1218_p1, %p1401_p3  ;;  %p1225_p6 = scmp.lt.s32.totalorder %s1223_s19, %s1217_s12 }
 0x4d8   : > { %p1220_p4 = pneg %p1219_p2  ;;  %p1226_p7 = por %p1225_p6, %p1224_p5 }
 0x4da   : > { %p1227_p8 = pnand %p1226_p7, %p1220_p4 }
 0x4dc   : > { %1230 = shalt.err (!%p1227_p8)
}
 0x4dd   : > { %s1231_s15 = scalar_lea.hbm %s1493_s30, 256  ;;  %s1235_s18 = scalar_lea.hbm %s1557_s6, 512 }
 0x4de   : > { %p1232_p10 = scmp.ne.s32.totalorder %s1493_s30, %s1231_s15  ;;  %p1236_p13 = scmp.lt.u32.totalorder %s1493_s30, %s1557_s6 }
 0x4df   : > { %p1237_p0 = scmp.lt.u32.totalorder %s1235_s18, %s1231_s15  ;;  %p1239_p2 = scmp.lt.u32.totalorder %s1231_s15, %s1493_s30 }
 0x4e0   : > { %p1233_p11 = pnand %p1232_p10, %p1401_p3 }
 0x4e1   : > { %p1238_p1 = por %p1237_p0, %p1236_p13 }
 0x4e2   : > { %p1234_p12 = pneg %p1233_p11 }
 0x4e3   : > { %p1240_p4 = por %p1239_p2, %p1238_p1 }
 0x4e5   : > { %p1241_p5 = pnand %p1240_p4, %p1234_p12 }
 0x4e7   : > { %1244 = shalt.err (!%p1241_p5)
}
 0x4e8   : > { %s1315_s12 = smov 128   ;;  %s1316_s25 = smov 8  }
 0x4e9   : > { %1135 = dma.vmem_to_hbm [thread:$0]  (%p1401_p3), %s1495_s14, 256, %s1493_s30, %s1499_s11, %s1315_s12, %s1315_s12, %s1316_s25  }
 0x4ea PF: > { %p1141_p6 = scmp.ge.s32.totalorder %s1311_s28, 2  ;;  %s861_s16 = sand.u32 1, %s1283_s21  }
 0x4eb   : > { %s862_s19 = scalar_lea.sflag [#allocation4], %s861_s16 }
 0x4ec   : > { %p1138_p7 = pnand %p1141_p6, %p1411_p9 }
 0x4ee   : > { %1278 = dma.done.wait (!%p1138_p7), %s862_s19, 256  }
 0x4ef   : > { %1280 = vsyncadd (!%p1138_p7), %s862_s19, 4294967040  ;;  %s19_s28 = sadd.s32 1, %s1311_s28   ;;  %s1560_s21 = smov %s1287_s22 }
 0x4f0   : > { %p16_p8 = scmp.ge.s32.totalorder %s19_s28, 18   ;;  %s1561_s22 = smov %s1291_s23 }
 0x4f1   : > { %s1562_s23 = smov %s1419_s13  ;;  %s1563_s24 = smov %s1303_s26 }
 0x4f2   : > { %s1564_s25 = smov %s1307_s27  ;;  %s1565_s26 = smov %s1568_s7 }
 0x4f3   : > { %s1566_s27 = smov %s1572_s8  ;;  %18 = sbr.rel (!%p16_p8) target bundleno = 5 (0x5), region = 91 }
 0x4fa   :  { %867 = vsyncpa [#allocation4], 1 }
 0x4fb   :  { %869 = vsyncpa [#allocation4 + $0x1], 1 }

</bundles_post_ra>
